<compile_context>
chip_gen: v7x
topology: tpu7x:2x2x1
jax: 0.10.0
libtpu: 0.0.40
codegen_flags: <defaults>
</compile_context>

<pallas_src>
import functools

import jax
import jax.numpy as jnp
import numpy as np
from jax import lax
from jax.experimental import pallas as pl
from jax.experimental.pallas import tpu as pltpu


def _dwconv_kernel(x_ref, m_ref, wd_ref, sd_ref, bd_ref, wp_ref, sp_ref,
                   bp_ref, o_ref, *, ksize, width):
    """One batch element: depthwise KxK + BN + SiLU -> 1x1 + BN + SiLU.

    x_ref : (1, Cin, L)     flattened image, L = H*W on the lane axis (VMEM)
    m_ref : (K*K, 1, L)     0/1 border masks, one per spatial tap
    wd_ref: (K*K, Cin, 1)   depthwise weights, wd_ref[kh*K+kw, c, 0]
    sd_ref, bd_ref: (Cin, 1)   folded BN scale/bias after the depthwise conv
    wp_ref: (Cin, Cout, 1)  pointwise weights, wp_ref[c, co, 0]
    sp_ref, bp_ref: (Cout, 1)  folded BN scale/bias after the pointwise conv
    o_ref : (1, Cout, L)
    """
    K = ksize
    pad = (K - 1) // 2
    _, Cin, L = x_ref.shape
    Cout = o_ref.shape[1]
    W = width

    x = x_ref[0].astype(jnp.float32)                         # (Cin, L)

    # ---- depthwise KxK conv: lane-roll + border mask (no padded window) ----
    acc = None
    for kh in range(K):
        for kw in range(K):
            s = (kh - pad) * W + (kw - pad)                  # flattened offset
            shifted = pltpu.roll(x, (-s) % L, 1) if s != 0 else x
            valid = m_ref[kh * K + kw] != 0.0                # (1, L) bool
            tap = jnp.where(valid, shifted, 0.0) * wd_ref[kh * K + kw]
            acc = tap if acc is None else acc + tap          # (Cin, L)

    # ---- folded BN + SiLU (exp and approx reciprocal both hit the EUP) -----
    y = acc * sd_ref[...] + bd_ref[...]
    y = y * pl.reciprocal(1.0 + jnp.exp(-y), approx=True)    # (Cin, L)

    # ---- pointwise 1x1 conv: accumulate straight into the (Cout, L) tile ---
    z = None
    for c in range(Cin):                                     # small static unroll
        contrib = y[c:c + 1, :] * wp_ref[c]                  # (1,L)*(Cout,1)
        z = contrib if z is None else z + contrib            # (Cout, L)

    z = z * sp_ref[...] + bp_ref[...]
    z = z * pl.reciprocal(1.0 + jnp.exp(-z), approx=True)
    o_ref[0] = z.astype(o_ref.dtype)                         # lane-dense store


@functools.partial(jax.jit, static_argnames=("ksize", "stride"))
def dwconv_forward(x, wd, sd, bd, wp, sp, bp, *, ksize=3, stride=1):
    """Fused DWConv forward (eval-mode BN folded into per-channel scale/bias).

    x : (N, Cin, H, W)   NCHW input (f32 or bf16; math runs in f32)
    wd: (Cin, K, K)      depthwise weight (PyTorch (Cin,1,K,K) squeezed)
    sd, bd: (Cin,)       folded BN scale/bias after the depthwise conv
    wp: (Cout, Cin)      pointwise weight (PyTorch (Cout,Cin,1,1) squeezed)
    sp, bp: (Cout,)      folded BN scale/bias after the pointwise conv
    """
    assert stride == 1                      # TODO(synk): strided depthwise conv
    K = ksize
    assert K % 2 == 1
    N, Cin, H, W = x.shape
    Cout = wp.shape[0]
    pad = (K - 1) // 2
    L = H * W
    # TODO(synk): pad / row-tile for lane-misaligned or very large feature maps.
    assert L % 128 == 0, "flattened spatial extent must be a multiple of 128"
    footprint = (2 * (Cin + Cout) * L * x.dtype.itemsize      # double-buffered IO
                 + 6 * (Cin + Cout) * L * 4)                  # f32 intermediates
    assert footprint < 24 * 1024 * 1024, "feature map too large for single-tile path"

    x3 = x.reshape(N, Cin, L)

    # ---- host-side (trace-time) constants: border masks + repacked weights --
    hh, ww = np.meshgrid(np.arange(H), np.arange(W), indexing="ij")
    masks = []
    for kh in range(K):
        for kw in range(K):
            dh, dw = kh - pad, kw - pad
            ok = ((hh + dh >= 0) & (hh + dh < H) &
                  (ww + dw >= 0) & (ww + dw < W))
            masks.append(ok.reshape(1, L))
    mask_arr = jnp.asarray(np.stack(masks, axis=0), jnp.float32)   # (K*K, 1, L)

    wd_t = jnp.transpose(wd.astype(jnp.float32).reshape(Cin, K * K), (1, 0))
    wd_t = wd_t.reshape(K * K, Cin, 1)                             # [tap, c, 0]
    wp_t = jnp.transpose(wp.astype(jnp.float32), (1, 0)).reshape(Cin, Cout, 1)
    sd_v = sd.astype(jnp.float32).reshape(Cin, 1)
    bd_v = bd.astype(jnp.float32).reshape(Cin, 1)
    sp_v = sp.astype(jnp.float32).reshape(Cout, 1)
    bp_v = bp.astype(jnp.float32).reshape(Cout, 1)

    def _const(shape):
        nd = len(shape)
        return pl.BlockSpec(shape, lambda n, _nd=nd: (0,) * _nd)

    out3 = pl.pallas_call(
        functools.partial(_dwconv_kernel, ksize=K, width=W),
        out_shape=jax.ShapeDtypeStruct((N, Cout, L), x.dtype),
        grid_spec=pltpu.PrefetchScalarGridSpec(
            num_scalar_prefetch=0,
            grid=(N,),
            in_specs=[
                pl.BlockSpec((1, Cin, L), lambda n: (n, 0, 0)),
                _const((K * K, 1, L)),
                _const((K * K, Cin, 1)),
                _const((Cin, 1)),
                _const((Cin, 1)),
                _const((Cin, Cout, 1)),
                _const((Cout, 1)),
                _const((Cout, 1)),
            ],
            out_specs=pl.BlockSpec((1, Cout, L), lambda n: (n, 0, 0)),
        ),
        compiler_params=pltpu.CompilerParams(
            dimension_semantics=("parallel",),
            vmem_limit_bytes=32 * 1024 * 1024,
        ),
    )(x3, mask_arr, wd_t, sd_v, bd_v, wp_t, sp_v, bp_v)
    return out3.reshape(N, Cout, H, W)


def _fold_bn(gamma, beta, mean, var, eps=1e-5):
    """Eval-mode BatchNorm -> per-channel affine (scale, bias)."""
    scale = gamma * lax.rsqrt(var + eps)
    return scale, beta - mean * scale


def _reference(x, wd, sd, bd, wp, sp, bp, ksize):
    """Pure-JAX reference (lax convs, exact sigmoid) for validation."""
    pad = (ksize - 1) // 2
    xn = jnp.transpose(x, (0, 2, 3, 1)).astype(jnp.float32)   # NHWC
    Cin = xn.shape[-1]
    wd_hwio = jnp.transpose(wd, (1, 2, 0))[:, :, None, :]     # (K,K,1,Cin)
    y = lax.conv_general_dilated(
        xn, wd_hwio, (1, 1), [(pad, pad), (pad, pad)],
        dimension_numbers=("NHWC", "HWIO", "NHWC"), feature_group_count=Cin)
    y = y * sd + bd
    y = y * jax.nn.sigmoid(y)
    wp_hwio = jnp.transpose(wp, (1, 0))[None, None, :, :]     # (1,1,Cin,Cout)
    z = lax.conv_general_dilated(
        y, wp_hwio, (1, 1), "VALID",
        dimension_numbers=("NHWC", "HWIO", "NHWC"))
    z = z * sp + bp
    z = z * jax.nn.sigmoid(z)
    return jnp.transpose(z, (0, 3, 1, 2))                     # NCHW


if __name__ == "__main__":
    N, Cin, Cout, H, W, K = 2, 4, 8, 16, 16, 3

    key = jax.random.PRNGKey(0)
    ks = jax.random.split(key, 11)

    x = jax.random.normal(ks[0], (N, Cin, H, W), jnp.float32)
    wd = jax.random.normal(ks[1], (Cin, K, K), jnp.float32) * 0.2
    wp = jax.random.normal(ks[2], (Cout, Cin), jnp.float32) * 0.2
    # Eval-mode BatchNorm parameters, folded to per-channel scale/bias.
    sd, bd = _fold_bn(1.0 + 0.1 * jax.random.normal(ks[3], (Cin,)),
                      0.1 * jax.random.normal(ks[4], (Cin,)),
                      0.1 * jax.random.normal(ks[5], (Cin,)),
                      0.5 + jnp.abs(jax.random.normal(ks[6], (Cin,))))
    sp, bp = _fold_bn(1.0 + 0.1 * jax.random.normal(ks[7], (Cout,)),
                      0.1 * jax.random.normal(ks[8], (Cout,)),
                      0.1 * jax.random.normal(ks[9], (Cout,)),
                      0.5 + jnp.abs(jax.random.normal(ks[10], (Cout,))))

    ref = _reference(x, wd, sd, bd, wp, sp, bp, K)

    out = dwconv_forward(x, wd, sd, bd, wp, sp, bp, ksize=K, stride=1)
    out = jax.block_until_ready(out)
    assert out.shape == (N, Cout, H, W)
    # Tolerance slightly looser than 1e-4 because SiLU uses the approximate
    # EUP reciprocal (pl.reciprocal(approx=True)) twice per element.
    np.testing.assert_allclose(np.asarray(out), np.asarray(ref),
                               rtol=2e-3, atol=2e-3)

    print("KERNEL_OK")
</pallas_src>

<mosaic_0001>
module attributes {stable_mosaic.version = 11 : i64} {
  func.func @_dwconv_kernel(%arg0: i32, %arg1: memref<1x4x256xf32, #tpu.memory_space<vmem>>, %arg2: memref<9x1x256xf32, #tpu.memory_space<vmem>>, %arg3: memref<9x4x1xf32, #tpu.memory_space<vmem>>, %arg4: memref<4x1xf32, #tpu.memory_space<vmem>>, %arg5: memref<4x1xf32, #tpu.memory_space<vmem>>, %arg6: memref<4x8x1xf32, #tpu.memory_space<vmem>>, %arg7: memref<8x1xf32, #tpu.memory_space<vmem>>, %arg8: memref<8x1xf32, #tpu.memory_space<vmem>>, %arg9: memref<1x8x256xf32, #tpu.memory_space<vmem>>) attributes {dimension_semantics = [#tpu.dimension_semantics<parallel>], iteration_bounds = array<i64: 2>, scalar_prefetch = 0 : i64, scratch_operands = 0 : i64, tpu.core_type = #tpu.core_type<tc>, window_params = [{transform_indices = @transform_0, window_bounds = array<i64: 1, 4, 256>}, {pipeline_mode = #tpu.pipeline_mode<synchronous>, transform_indices = @transform_1, window_bounds = array<i64: 9, 1, 256>}, {pipeline_mode = #tpu.pipeline_mode<synchronous>, transform_indices = @transform_2, window_bounds = array<i64: 9, 4, 1>}, {pipeline_mode = #tpu.pipeline_mode<synchronous>, transform_indices = @transform_3, window_bounds = array<i64: 4, 1>}, {pipeline_mode = #tpu.pipeline_mode<synchronous>, transform_indices = @transform_4, window_bounds = array<i64: 4, 1>}, {pipeline_mode = #tpu.pipeline_mode<synchronous>, transform_indices = @transform_5, window_bounds = array<i64: 4, 8, 1>}, {pipeline_mode = #tpu.pipeline_mode<synchronous>, transform_indices = @transform_6, window_bounds = array<i64: 8, 1>}, {pipeline_mode = #tpu.pipeline_mode<synchronous>, transform_indices = @transform_7, window_bounds = array<i64: 8, 1>}, {transform_indices = @transform_8, window_bounds = array<i64: 1, 8, 256>}]} {
    %c0 = arith.constant 0 : index
    %c0_0 = arith.constant 0 : index
    %c0_1 = arith.constant 0 : index
    %0 = vector.load %arg1[%c0, %c0_0, %c0_1] : memref<1x4x256xf32, #tpu.memory_space<vmem>>, vector<1x4x256xf32>
    %1 = vector.shape_cast %0 : vector<1x4x256xf32> to vector<4x256xf32>
    %c17_i32 = arith.constant 17 : i32
    %2 = tpu.dynamic_rotate %1 by %c17_i32 dim 1 : vector<4x256xf32>, i32 -> vector<4x256xf32>
    %c0_2 = arith.constant 0 : index
    %c0_3 = arith.constant 0 : index
    %c0_4 = arith.constant 0 : index
    %3 = vector.load %arg2[%c0_2, %c0_3, %c0_4] : memref<9x1x256xf32, #tpu.memory_space<vmem>>, vector<1x1x256xf32>
    %4 = vector.shape_cast %3 : vector<1x1x256xf32> to vector<1x256xf32>
    %cst = arith.constant 0.000000e+00 : f32
    %5 = vector.broadcast %cst : f32 to vector<1x256xf32>
    %6 = arith.cmpf one, %4, %5 : vector<1x256xf32>
    %cst_5 = arith.constant 0.000000e+00 : f32
    %7 = vector.shape_cast %6 : vector<1x256xi1> to vector<1x256xi1>
    %8 = vector.broadcast %7 : vector<1x256xi1> to vector<4x256xi1>
    %9 = vector.broadcast %cst_5 : f32 to vector<4x256xf32>
    %10 = arith.select %8, %2, %9 : vector<4x256xi1>, vector<4x256xf32>
    %c0_6 = arith.constant 0 : index
    %c0_7 = arith.constant 0 : index
    %c0_8 = arith.constant 0 : index
    %11 = vector.load %arg3[%c0_6, %c0_7, %c0_8] : memref<9x4x1xf32, #tpu.memory_space<vmem>>, vector<1x4x1xf32>
    %12 = vector.shape_cast %11 : vector<1x4x1xf32> to vector<4x1xf32>
    %13 = vector.broadcast %12 : vector<4x1xf32> to vector<4x256xf32>
    %14 = arith.mulf %10, %13 : vector<4x256xf32>
    %c16_i32 = arith.constant 16 : i32
    %15 = tpu.dynamic_rotate %1 by %c16_i32 dim 1 : vector<4x256xf32>, i32 -> vector<4x256xf32>
    %c1 = arith.constant 1 : index
    %c0_9 = arith.constant 0 : index
    %c0_10 = arith.constant 0 : index
    %16 = vector.load %arg2[%c1, %c0_9, %c0_10] : memref<9x1x256xf32, #tpu.memory_space<vmem>>, vector<1x1x256xf32>
    %17 = vector.shape_cast %16 : vector<1x1x256xf32> to vector<1x256xf32>
    %cst_11 = arith.constant 0.000000e+00 : f32
    %18 = vector.broadcast %cst_11 : f32 to vector<1x256xf32>
    %19 = arith.cmpf one, %17, %18 : vector<1x256xf32>
    %cst_12 = arith.constant 0.000000e+00 : f32
    %20 = vector.shape_cast %19 : vector<1x256xi1> to vector<1x256xi1>
    %21 = vector.broadcast %20 : vector<1x256xi1> to vector<4x256xi1>
    %22 = vector.broadcast %cst_12 : f32 to vector<4x256xf32>
    %23 = arith.select %21, %15, %22 : vector<4x256xi1>, vector<4x256xf32>
    %c1_13 = arith.constant 1 : index
    %c0_14 = arith.constant 0 : index
    %c0_15 = arith.constant 0 : index
    %24 = vector.load %arg3[%c1_13, %c0_14, %c0_15] : memref<9x4x1xf32, #tpu.memory_space<vmem>>, vector<1x4x1xf32>
    %25 = vector.shape_cast %24 : vector<1x4x1xf32> to vector<4x1xf32>
    %26 = vector.broadcast %25 : vector<4x1xf32> to vector<4x256xf32>
    %27 = arith.mulf %23, %26 : vector<4x256xf32>
    %28 = arith.addf %14, %27 : vector<4x256xf32>
    %c15_i32 = arith.constant 15 : i32
    %29 = tpu.dynamic_rotate %1 by %c15_i32 dim 1 : vector<4x256xf32>, i32 -> vector<4x256xf32>
    %c2 = arith.constant 2 : index
    %c0_16 = arith.constant 0 : index
    %c0_17 = arith.constant 0 : index
    %30 = vector.load %arg2[%c2, %c0_16, %c0_17] : memref<9x1x256xf32, #tpu.memory_space<vmem>>, vector<1x1x256xf32>
    %31 = vector.shape_cast %30 : vector<1x1x256xf32> to vector<1x256xf32>
    %cst_18 = arith.constant 0.000000e+00 : f32
    %32 = vector.broadcast %cst_18 : f32 to vector<1x256xf32>
    %33 = arith.cmpf one, %31, %32 : vector<1x256xf32>
    %cst_19 = arith.constant 0.000000e+00 : f32
    %34 = vector.shape_cast %33 : vector<1x256xi1> to vector<1x256xi1>
    %35 = vector.broadcast %34 : vector<1x256xi1> to vector<4x256xi1>
    %36 = vector.broadcast %cst_19 : f32 to vector<4x256xf32>
    %37 = arith.select %35, %29, %36 : vector<4x256xi1>, vector<4x256xf32>
    %c2_20 = arith.constant 2 : index
    %c0_21 = arith.constant 0 : index
    %c0_22 = arith.constant 0 : index
    %38 = vector.load %arg3[%c2_20, %c0_21, %c0_22] : memref<9x4x1xf32, #tpu.memory_space<vmem>>, vector<1x4x1xf32>
    %39 = vector.shape_cast %38 : vector<1x4x1xf32> to vector<4x1xf32>
    %40 = vector.broadcast %39 : vector<4x1xf32> to vector<4x256xf32>
    %41 = arith.mulf %37, %40 : vector<4x256xf32>
    %42 = arith.addf %28, %41 : vector<4x256xf32>
    %c1_i32 = arith.constant 1 : i32
    %43 = tpu.dynamic_rotate %1 by %c1_i32 dim 1 : vector<4x256xf32>, i32 -> vector<4x256xf32>
    %c3 = arith.constant 3 : index
    %c0_23 = arith.constant 0 : index
    %c0_24 = arith.constant 0 : index
    %44 = vector.load %arg2[%c3, %c0_23, %c0_24] : memref<9x1x256xf32, #tpu.memory_space<vmem>>, vector<1x1x256xf32>
    %45 = vector.shape_cast %44 : vector<1x1x256xf32> to vector<1x256xf32>
    %cst_25 = arith.constant 0.000000e+00 : f32
    %46 = vector.broadcast %cst_25 : f32 to vector<1x256xf32>
    %47 = arith.cmpf one, %45, %46 : vector<1x256xf32>
    %cst_26 = arith.constant 0.000000e+00 : f32
    %48 = vector.shape_cast %47 : vector<1x256xi1> to vector<1x256xi1>
    %49 = vector.broadcast %48 : vector<1x256xi1> to vector<4x256xi1>
    %50 = vector.broadcast %cst_26 : f32 to vector<4x256xf32>
    %51 = arith.select %49, %43, %50 : vector<4x256xi1>, vector<4x256xf32>
    %c3_27 = arith.constant 3 : index
    %c0_28 = arith.constant 0 : index
    %c0_29 = arith.constant 0 : index
    %52 = vector.load %arg3[%c3_27, %c0_28, %c0_29] : memref<9x4x1xf32, #tpu.memory_space<vmem>>, vector<1x4x1xf32>
    %53 = vector.shape_cast %52 : vector<1x4x1xf32> to vector<4x1xf32>
    %54 = vector.broadcast %53 : vector<4x1xf32> to vector<4x256xf32>
    %55 = arith.mulf %51, %54 : vector<4x256xf32>
    %56 = arith.addf %42, %55 : vector<4x256xf32>
    %c4 = arith.constant 4 : index
    %c0_30 = arith.constant 0 : index
    %c0_31 = arith.constant 0 : index
    %57 = vector.load %arg2[%c4, %c0_30, %c0_31] : memref<9x1x256xf32, #tpu.memory_space<vmem>>, vector<1x1x256xf32>
    %58 = vector.shape_cast %57 : vector<1x1x256xf32> to vector<1x256xf32>
    %cst_32 = arith.constant 0.000000e+00 : f32
    %59 = vector.broadcast %cst_32 : f32 to vector<1x256xf32>
    %60 = arith.cmpf one, %58, %59 : vector<1x256xf32>
    %cst_33 = arith.constant 0.000000e+00 : f32
    %61 = vector.shape_cast %60 : vector<1x256xi1> to vector<1x256xi1>
    %62 = vector.broadcast %61 : vector<1x256xi1> to vector<4x256xi1>
    %63 = vector.broadcast %cst_33 : f32 to vector<4x256xf32>
    %64 = arith.select %62, %1, %63 : vector<4x256xi1>, vector<4x256xf32>
    %c4_34 = arith.constant 4 : index
    %c0_35 = arith.constant 0 : index
    %c0_36 = arith.constant 0 : index
    %65 = vector.load %arg3[%c4_34, %c0_35, %c0_36] : memref<9x4x1xf32, #tpu.memory_space<vmem>>, vector<1x4x1xf32>
    %66 = vector.shape_cast %65 : vector<1x4x1xf32> to vector<4x1xf32>
    %67 = vector.broadcast %66 : vector<4x1xf32> to vector<4x256xf32>
    %68 = arith.mulf %64, %67 : vector<4x256xf32>
    %69 = arith.addf %56, %68 : vector<4x256xf32>
    %c255_i32 = arith.constant 255 : i32
    %70 = tpu.dynamic_rotate %1 by %c255_i32 dim 1 : vector<4x256xf32>, i32 -> vector<4x256xf32>
    %c5 = arith.constant 5 : index
    %c0_37 = arith.constant 0 : index
    %c0_38 = arith.constant 0 : index
    %71 = vector.load %arg2[%c5, %c0_37, %c0_38] : memref<9x1x256xf32, #tpu.memory_space<vmem>>, vector<1x1x256xf32>
    %72 = vector.shape_cast %71 : vector<1x1x256xf32> to vector<1x256xf32>
    %cst_39 = arith.constant 0.000000e+00 : f32
    %73 = vector.broadcast %cst_39 : f32 to vector<1x256xf32>
    %74 = arith.cmpf one, %72, %73 : vector<1x256xf32>
    %cst_40 = arith.constant 0.000000e+00 : f32
    %75 = vector.shape_cast %74 : vector<1x256xi1> to vector<1x256xi1>
    %76 = vector.broadcast %75 : vector<1x256xi1> to vector<4x256xi1>
    %77 = vector.broadcast %cst_40 : f32 to vector<4x256xf32>
    %78 = arith.select %76, %70, %77 : vector<4x256xi1>, vector<4x256xf32>
    %c5_41 = arith.constant 5 : index
    %c0_42 = arith.constant 0 : index
    %c0_43 = arith.constant 0 : index
    %79 = vector.load %arg3[%c5_41, %c0_42, %c0_43] : memref<9x4x1xf32, #tpu.memory_space<vmem>>, vector<1x4x1xf32>
    %80 = vector.shape_cast %79 : vector<1x4x1xf32> to vector<4x1xf32>
    %81 = vector.broadcast %80 : vector<4x1xf32> to vector<4x256xf32>
    %82 = arith.mulf %78, %81 : vector<4x256xf32>
    %83 = arith.addf %69, %82 : vector<4x256xf32>
    %c241_i32 = arith.constant 241 : i32
    %84 = tpu.dynamic_rotate %1 by %c241_i32 dim 1 : vector<4x256xf32>, i32 -> vector<4x256xf32>
    %c6 = arith.constant 6 : index
    %c0_44 = arith.constant 0 : index
    %c0_45 = arith.constant 0 : index
    %85 = vector.load %arg2[%c6, %c0_44, %c0_45] : memref<9x1x256xf32, #tpu.memory_space<vmem>>, vector<1x1x256xf32>
    %86 = vector.shape_cast %85 : vector<1x1x256xf32> to vector<1x256xf32>
    %cst_46 = arith.constant 0.000000e+00 : f32
    %87 = vector.broadcast %cst_46 : f32 to vector<1x256xf32>
    %88 = arith.cmpf one, %86, %87 : vector<1x256xf32>
    %cst_47 = arith.constant 0.000000e+00 : f32
    %89 = vector.shape_cast %88 : vector<1x256xi1> to vector<1x256xi1>
    %90 = vector.broadcast %89 : vector<1x256xi1> to vector<4x256xi1>
    %91 = vector.broadcast %cst_47 : f32 to vector<4x256xf32>
    %92 = arith.select %90, %84, %91 : vector<4x256xi1>, vector<4x256xf32>
    %c6_48 = arith.constant 6 : index
    %c0_49 = arith.constant 0 : index
    %c0_50 = arith.constant 0 : index
    %93 = vector.load %arg3[%c6_48, %c0_49, %c0_50] : memref<9x4x1xf32, #tpu.memory_space<vmem>>, vector<1x4x1xf32>
    %94 = vector.shape_cast %93 : vector<1x4x1xf32> to vector<4x1xf32>
    %95 = vector.broadcast %94 : vector<4x1xf32> to vector<4x256xf32>
    %96 = arith.mulf %92, %95 : vector<4x256xf32>
    %97 = arith.addf %83, %96 : vector<4x256xf32>
    %c240_i32 = arith.constant 240 : i32
    %98 = tpu.dynamic_rotate %1 by %c240_i32 dim 1 : vector<4x256xf32>, i32 -> vector<4x256xf32>
    %c7 = arith.constant 7 : index
    %c0_51 = arith.constant 0 : index
    %c0_52 = arith.constant 0 : index
    %99 = vector.load %arg2[%c7, %c0_51, %c0_52] : memref<9x1x256xf32, #tpu.memory_space<vmem>>, vector<1x1x256xf32>
    %100 = vector.shape_cast %99 : vector<1x1x256xf32> to vector<1x256xf32>
    %cst_53 = arith.constant 0.000000e+00 : f32
    %101 = vector.broadcast %cst_53 : f32 to vector<1x256xf32>
    %102 = arith.cmpf one, %100, %101 : vector<1x256xf32>
    %cst_54 = arith.constant 0.000000e+00 : f32
    %103 = vector.shape_cast %102 : vector<1x256xi1> to vector<1x256xi1>
    %104 = vector.broadcast %103 : vector<1x256xi1> to vector<4x256xi1>
    %105 = vector.broadcast %cst_54 : f32 to vector<4x256xf32>
    %106 = arith.select %104, %98, %105 : vector<4x256xi1>, vector<4x256xf32>
    %c7_55 = arith.constant 7 : index
    %c0_56 = arith.constant 0 : index
    %c0_57 = arith.constant 0 : index
    %107 = vector.load %arg3[%c7_55, %c0_56, %c0_57] : memref<9x4x1xf32, #tpu.memory_space<vmem>>, vector<1x4x1xf32>
    %108 = vector.shape_cast %107 : vector<1x4x1xf32> to vector<4x1xf32>
    %109 = vector.broadcast %108 : vector<4x1xf32> to vector<4x256xf32>
    %110 = arith.mulf %106, %109 : vector<4x256xf32>
    %111 = arith.addf %97, %110 : vector<4x256xf32>
    %c239_i32 = arith.constant 239 : i32
    %112 = tpu.dynamic_rotate %1 by %c239_i32 dim 1 : vector<4x256xf32>, i32 -> vector<4x256xf32>
    %c8 = arith.constant 8 : index
    %c0_58 = arith.constant 0 : index
    %c0_59 = arith.constant 0 : index
    %113 = vector.load %arg2[%c8, %c0_58, %c0_59] : memref<9x1x256xf32, #tpu.memory_space<vmem>>, vector<1x1x256xf32>
    %114 = vector.shape_cast %113 : vector<1x1x256xf32> to vector<1x256xf32>
    %cst_60 = arith.constant 0.000000e+00 : f32
    %115 = vector.broadcast %cst_60 : f32 to vector<1x256xf32>
    %116 = arith.cmpf one, %114, %115 : vector<1x256xf32>
    %cst_61 = arith.constant 0.000000e+00 : f32
    %117 = vector.shape_cast %116 : vector<1x256xi1> to vector<1x256xi1>
    %118 = vector.broadcast %117 : vector<1x256xi1> to vector<4x256xi1>
    %119 = vector.broadcast %cst_61 : f32 to vector<4x256xf32>
    %120 = arith.select %118, %112, %119 : vector<4x256xi1>, vector<4x256xf32>
    %c8_62 = arith.constant 8 : index
    %c0_63 = arith.constant 0 : index
    %c0_64 = arith.constant 0 : index
    %121 = vector.load %arg3[%c8_62, %c0_63, %c0_64] : memref<9x4x1xf32, #tpu.memory_space<vmem>>, vector<1x4x1xf32>
    %122 = vector.shape_cast %121 : vector<1x4x1xf32> to vector<4x1xf32>
    %123 = vector.broadcast %122 : vector<4x1xf32> to vector<4x256xf32>
    %124 = arith.mulf %120, %123 : vector<4x256xf32>
    %125 = arith.addf %111, %124 : vector<4x256xf32>
    %c0_65 = arith.constant 0 : index
    %c0_66 = arith.constant 0 : index
    %126 = vector.load %arg4[%c0_65, %c0_66] : memref<4x1xf32, #tpu.memory_space<vmem>>, vector<4x1xf32>
    %127 = vector.broadcast %126 : vector<4x1xf32> to vector<4x256xf32>
    %128 = arith.mulf %125, %127 : vector<4x256xf32>
    %c0_67 = arith.constant 0 : index
    %c0_68 = arith.constant 0 : index
    %129 = vector.load %arg5[%c0_67, %c0_68] : memref<4x1xf32, #tpu.memory_space<vmem>>, vector<4x1xf32>
    %130 = vector.broadcast %129 : vector<4x1xf32> to vector<4x256xf32>
    %131 = arith.addf %128, %130 : vector<4x256xf32>
    %cst_69 = arith.constant 0.000000e+00 : f32
    %132 = vector.broadcast %cst_69 : f32 to vector<4x256xf32>
    %133 = arith.subf %132, %131 : vector<4x256xf32>
    %134 = math.exp %133 : vector<4x256xf32>
    %cst_70 = arith.constant 1.000000e+00 : f32
    %135 = vector.broadcast %cst_70 : f32 to vector<4x256xf32>
    %136 = arith.addf %135, %134 : vector<4x256xf32>
    %137 = tpu.reciprocal %136 {approx = true} : vector<4x256xf32> -> vector<4x256xf32>
    %138 = arith.mulf %131, %137 : vector<4x256xf32>
    %139 = vector.extract_strided_slice %138 {offsets = [0, 0], sizes = [1, 256], strides = [1, 1]} : vector<4x256xf32> to vector<1x256xf32>
    %c0_71 = arith.constant 0 : index
    %c0_72 = arith.constant 0 : index
    %c0_73 = arith.constant 0 : index
    %140 = vector.load %arg6[%c0_71, %c0_72, %c0_73] : memref<4x8x1xf32, #tpu.memory_space<vmem>>, vector<1x8x1xf32>
    %141 = vector.shape_cast %140 : vector<1x8x1xf32> to vector<8x1xf32>
    %142 = vector.broadcast %139 : vector<1x256xf32> to vector<8x256xf32>
    %143 = vector.broadcast %141 : vector<8x1xf32> to vector<8x256xf32>
    %144 = arith.mulf %142, %143 : vector<8x256xf32>
    %145 = vector.extract_strided_slice %138 {offsets = [1, 0], sizes = [1, 256], strides = [1, 1]} : vector<4x256xf32> to vector<1x256xf32>
    %c1_74 = arith.constant 1 : index
    %c0_75 = arith.constant 0 : index
    %c0_76 = arith.constant 0 : index
    %146 = vector.load %arg6[%c1_74, %c0_75, %c0_76] : memref<4x8x1xf32, #tpu.memory_space<vmem>>, vector<1x8x1xf32>
    %147 = vector.shape_cast %146 : vector<1x8x1xf32> to vector<8x1xf32>
    %148 = vector.broadcast %145 : vector<1x256xf32> to vector<8x256xf32>
    %149 = vector.broadcast %147 : vector<8x1xf32> to vector<8x256xf32>
    %150 = arith.mulf %148, %149 : vector<8x256xf32>
    %151 = arith.addf %144, %150 : vector<8x256xf32>
    %152 = vector.extract_strided_slice %138 {offsets = [2, 0], sizes = [1, 256], strides = [1, 1]} : vector<4x256xf32> to vector<1x256xf32>
    %c2_77 = arith.constant 2 : index
    %c0_78 = arith.constant 0 : index
    %c0_79 = arith.constant 0 : index
    %153 = vector.load %arg6[%c2_77, %c0_78, %c0_79] : memref<4x8x1xf32, #tpu.memory_space<vmem>>, vector<1x8x1xf32>
    %154 = vector.shape_cast %153 : vector<1x8x1xf32> to vector<8x1xf32>
    %155 = vector.broadcast %152 : vector<1x256xf32> to vector<8x256xf32>
    %156 = vector.broadcast %154 : vector<8x1xf32> to vector<8x256xf32>
    %157 = arith.mulf %155, %156 : vector<8x256xf32>
    %158 = arith.addf %151, %157 : vector<8x256xf32>
    %159 = vector.extract_strided_slice %138 {offsets = [3, 0], sizes = [1, 256], strides = [1, 1]} : vector<4x256xf32> to vector<1x256xf32>
    %c3_80 = arith.constant 3 : index
    %c0_81 = arith.constant 0 : index
    %c0_82 = arith.constant 0 : index
    %160 = vector.load %arg6[%c3_80, %c0_81, %c0_82] : memref<4x8x1xf32, #tpu.memory_space<vmem>>, vector<1x8x1xf32>
    %161 = vector.shape_cast %160 : vector<1x8x1xf32> to vector<8x1xf32>
    %162 = vector.broadcast %159 : vector<1x256xf32> to vector<8x256xf32>
    %163 = vector.broadcast %161 : vector<8x1xf32> to vector<8x256xf32>
    %164 = arith.mulf %162, %163 : vector<8x256xf32>
    %165 = arith.addf %158, %164 : vector<8x256xf32>
    %c0_83 = arith.constant 0 : index
    %c0_84 = arith.constant 0 : index
    %166 = vector.load %arg7[%c0_83, %c0_84] : memref<8x1xf32, #tpu.memory_space<vmem>>, vector<8x1xf32>
    %167 = vector.broadcast %166 : vector<8x1xf32> to vector<8x256xf32>
    %168 = arith.mulf %165, %167 : vector<8x256xf32>
    %c0_85 = arith.constant 0 : index
    %c0_86 = arith.constant 0 : index
    %169 = vector.load %arg8[%c0_85, %c0_86] : memref<8x1xf32, #tpu.memory_space<vmem>>, vector<8x1xf32>
    %170 = vector.broadcast %169 : vector<8x1xf32> to vector<8x256xf32>
    %171 = arith.addf %168, %170 : vector<8x256xf32>
    %cst_87 = arith.constant 0.000000e+00 : f32
    %172 = vector.broadcast %cst_87 : f32 to vector<8x256xf32>
    %173 = arith.subf %172, %171 : vector<8x256xf32>
    %174 = math.exp %173 : vector<8x256xf32>
    %cst_88 = arith.constant 1.000000e+00 : f32
    %175 = vector.broadcast %cst_88 : f32 to vector<8x256xf32>
    %176 = arith.addf %175, %174 : vector<8x256xf32>
    %177 = tpu.reciprocal %176 {approx = true} : vector<8x256xf32> -> vector<8x256xf32>
    %178 = arith.mulf %171, %177 : vector<8x256xf32>
    %c0_89 = arith.constant 0 : index
    %c0_90 = arith.constant 0 : index
    %c0_91 = arith.constant 0 : index
    %179 = vector.load %arg9[%c0_89, %c0_90, %c0_91] : memref<1x8x256xf32, #tpu.memory_space<vmem>>, vector<1x8x256xf32>
    %180 = vector.shape_cast %179 : vector<1x8x256xf32> to vector<8x256xf32>
    %181 = vector.shape_cast %178 : vector<8x256xf32> to vector<1x8x256xf32>
    tpu.vector_store %arg9[%c0_89, %c0_90, %c0_91], %181 {strides = array<i32>} : memref<1x8x256xf32, #tpu.memory_space<vmem>>, vector<1x8x256xf32>,
    return
  }
  func.func @transform_0(%arg0: i32) -> (i32, i32, i32) {
    %c0_i32 = arith.constant 0 : i32
    %c0_i32_0 = arith.constant 0 : i32
    %c0_i32_1 = arith.constant 0 : i32
    return %arg0, %c0_i32, %c0_i32_0 : i32, i32, i32
  }
  func.func @transform_1(%arg0: i32) -> (i32, i32, i32) {
    %c0_i32 = arith.constant 0 : i32
    %c0_i32_0 = arith.constant 0 : i32
    %c0_i32_1 = arith.constant 0 : i32
    %c0_i32_2 = arith.constant 0 : i32
    return %c0_i32, %c0_i32_0, %c0_i32_1 : i32, i32, i32
  }
  func.func @transform_2(%arg0: i32) -> (i32, i32, i32) {
    %c0_i32 = arith.constant 0 : i32
    %c0_i32_0 = arith.constant 0 : i32
    %c0_i32_1 = arith.constant 0 : i32
    %c0_i32_2 = arith.constant 0 : i32
    return %c0_i32, %c0_i32_0, %c0_i32_1 : i32, i32, i32
  }
  func.func @transform_3(%arg0: i32) -> (i32, i32) {
    %c0_i32 = arith.constant 0 : i32
    %c0_i32_0 = arith.constant 0 : i32
    %c0_i32_1 = arith.constant 0 : i32
    return %c0_i32, %c0_i32_0 : i32, i32
  }
  func.func @transform_4(%arg0: i32) -> (i32, i32) {
    %c0_i32 = arith.constant 0 : i32
    %c0_i32_0 = arith.constant 0 : i32
    %c0_i32_1 = arith.constant 0 : i32
    return %c0_i32, %c0_i32_0 : i32, i32
  }
  func.func @transform_5(%arg0: i32) -> (i32, i32, i32) {
    %c0_i32 = arith.constant 0 : i32
    %c0_i32_0 = arith.constant 0 : i32
    %c0_i32_1 = arith.constant 0 : i32
    %c0_i32_2 = arith.constant 0 : i32
    return %c0_i32, %c0_i32_0, %c0_i32_1 : i32, i32, i32
  }
  func.func @transform_6(%arg0: i32) -> (i32, i32) {
    %c0_i32 = arith.constant 0 : i32
    %c0_i32_0 = arith.constant 0 : i32
    %c0_i32_1 = arith.constant 0 : i32
    return %c0_i32, %c0_i32_0 : i32, i32
  }
  func.func @transform_7(%arg0: i32) -> (i32, i32) {
    %c0_i32 = arith.constant 0 : i32
    %c0_i32_0 = arith.constant 0 : i32
    %c0_i32_1 = arith.constant 0 : i32
    return %c0_i32, %c0_i32_0 : i32, i32
  }
  func.func @transform_8(%arg0: i32) -> (i32, i32, i32) {
    %c0_i32 = arith.constant 0 : i32
    %c0_i32_0 = arith.constant 0 : i32
    %c0_i32_1 = arith.constant 0 : i32
    return %arg0, %c0_i32, %c0_i32_0 : i32, i32, i32
  }
}

</mosaic_0001>

<bundles_post_ra>
// kernel: dwconv_forward.1
= control target key start
LH: loop header
LB: loop body
LE: loop exit
PB: predicated region body
PF: predicated region fallthrough
CT: control target
= control target key end

     0   :  { %s923_s27 = smov 0   ;;  %s1181_s0 = inlined_call_operand.vmem [shape: f32[2,4,256], index: 0, kind: input, shape index: {}]   ;;  %s1182_s1 = inlined_call_operand.vmem [shape: f32[9,1,256], index: 1, kind: input, shape index: {}]   ;;  %s1183_s2 = inlined_call_operand.vmem [shape: f32[9,4,1], index: 2, kind: input, shape index: {}]   ;;  %s1184_s3 = inlined_call_operand.vmem [shape: f32[4,1], index: 3, kind: input, shape index: {}]   ;;  %s1185_s4 = inlined_call_operand.vmem [shape: f32[4,1], index: 4, kind: input, shape index: {}]   ;;  %s1186_s5 = inlined_call_operand.vmem [shape: f32[4,8,1], index: 5, kind: input, shape index: {}]   ;;  %s1187_s6 = inlined_call_operand.vmem [shape: f32[8,1], index: 6, kind: input, shape index: {}]   ;;  %s1188_s7 = inlined_call_operand.vmem [shape: f32[8,1], index: 7, kind: input, shape index: {}]   ;;  %s1189_s8 = inlined_call_operand.vmem [shape: f32[2,8,256], index: 8, kind: output, shape index: {}]  }
   0x1 LB: > { %s793_s28 = sadd.s32 4294967295, %s867_s27   ;;  %p797_p0 = scmp.ge.s32.totalorder %s867_s27, 1  ;;  %s867_s27 = sphi %s923_s27, %s18_s27  }
   0x2   : > { %p262_p1 = scmp.lt.s32.totalorder %s867_s27, 3 }
   0x4   : > { %p263_p2 = pnand %p797_p0, %p262_p1 }
   0x5   : > { %v805_v0 = vld [vmem:[%s1183_s2 + $0x8] sm:$0xf] (!%p263_p2)  ;;  %v334_v1 = vld [vmem:[%s1183_s2] sm:$0xf] (!%p263_p2)  ;;  %p296_p3 = scmp.lt.s32.totalorder (!%p263_p2), %s793_s28, 1  ;;  %v869_v2 = vmov (!%p263_p2), 0   ;;  %v314_v5 = vlaneseq (!%p263_p2) }
   0x6   : > { %266 = sbr.rel (%p263_p2) target bundleno = 273 (0x111), region = 52  ;;  %843 = vset.pattern.permute.xlu1 (!%p263_p2), %v869_v2  ;;  %842 = vset.pattern.permute.xlu0 (!%p263_p2), %v869_v2  ;;  %v807_v3 = vld [vmem:[%s1183_s2 + $0xc] sm:$0xf] (!%p263_p2)  ;;  %v803_v4 = vld [vmem:[%s1183_s2 + $0x4] sm:$0xf] (!%p263_p2)  ;;  %s870_s19 = smov (!%p263_p2), 17  }
   0x7   : > { %403 = vperm.xlu1 (!%p263_p2), %843, %v805_v0   ;;  %337 = vperm.xlu0 (!%p263_p2), %842, %v334_v1   ;;  %v958_v8 = vshrl.u32 (!%p263_p2), %v314_v5, 7  ;;  %v808_v9 = vld [vmem:[%s1182_s1 + $0x8] sm:$0x3] (!%p263_p2)  ;;  %s871_s22 = smov (!%p263_p2), 16   ;;  %v809_v13 = vld [vmem:[%s1183_s2 + $0x10] sm:$0xf] (!%p263_p2) }
   0x8   : > { %vm446_vm0 = vcmp.ne.f32.partialorder (!%p263_p2), %v808_v9, 0.0  ;;  %s872_s25 = smov (!%p263_p2), 15   ;;  %v811_v20 = vld [vmem:[%s1183_s2 + $0x14] sm:$0xf] (!%p263_p2)  ;;  %s873_s30 = smov (!%p263_p2), 1   ;;  %v635_v26 = vld [vmem:[%s1186_s5] sm:$0xff] (!%p263_p2) }
   0x9   : > { %v966_v10 = vsub.s32 (!%p263_p2), 0, %v958_v8  ;;  %v969_v11 = vsub.s32 (!%p263_p2), 1, %v958_v8  ;;  %v447_v12 = vsel (!%p263_p2), %vm446_vm0, 1, %v869_v2  ;;  %v813_v21 = vld [vmem:[%s1183_s2 + $0x18] sm:$0xf] (!%p263_p2)  ;;  %s874_s13 = smov (!%p263_p2), 127  }
   0xa   : > { %v815_v22 = vld [vmem:[%s1183_s2 + $0x1c] sm:$0xf] (!%p263_p2)  ;;  %v817_v23 = vld [vmem:[%s1183_s2 + $0x20] sm:$0xf] (!%p263_p2)  ;;  %s875_s16 = smov (!%p263_p2), 113   ;;  %s876_s17 = smov (!%p263_p2), 112  }
   0xb   : > { %437 = vperm.xlu1 (!%p263_p2), %843, %v807_v3   ;;  %369 = vperm.xlu0 (!%p263_p2), %842, %v803_v4   ;;  %v451_v14 = vrot.slane (!%p263_p2), %v447_v12, %v966_v10  ;;  %v455_v15 = vrot.slane (!%p263_p2), %v447_v12, %v969_v11  ;;  %v607_v24 = vld [vmem:[%s1184_s3] sm:$0xf] (!%p263_p2)  ;;  %s877_s20 = smov (!%p263_p2), 111   ;;  %v818_v27 = vld [vmem:[%s1186_s5 + $0x8] sm:$0xff] (!%p263_p2)  ;;  %v819_v28 = vld [vmem:[%s1186_s5 + $0x10] sm:$0xff] (!%p263_p2)  ;;  %v1059_v43 = vand.u32 (!%p263_p2), 127, %v314_v5 }
   0xc   : > { %v615_v25 = vld [vmem:[%s1185_s4] sm:$0xf] (!%p263_p2)  ;;  %v820_v29 = vld [vmem:[%s1186_s5 + $0x18] sm:$0xff] (!%p263_p2)  ;;  %v804_v38 = vld [vmem:[%s1182_s1 + $0x4] sm:$0x3] (!%p263_p2) }
   0xd   : > { %s1211_s28 = smov (!%p296_p3, %s793_s28), 1  ;;  %vm979_vm1 = vcmp.eq.s32.totalorder %v451_v14, 1  ;;  %vm983_vm2 = vcmp.eq.s32.totalorder %v455_v15, 1  ;;  %v708_v30 = vld [vmem:[%s1187_s6] sm:$0xff]  ;;  %vm385_vm5 = vcmp.ne.f32.partialorder %v804_v38, 0.0  ;;  %vm346_vm7 = vcmp.lt.s32.totalorder %v1059_v43, 16 }
   0xe   : > { %s823_s15 = sshll.u32 %s1211_s28, 3  ;;  %v716_v31 = vld [vmem:[%s1188_s7] sm:$0xff]  ;;  %v386_v49 = vsel %vm385_vm5, 1, %v869_v2  ;;  %vm316_vm8 = vcmp.lt.s32.totalorder %v1059_v43, 17  ;;  %v810_v62 = vld [vmem:[%s1182_s1 + $0xa] sm:$0x3] }
   0xf   : > { %s300_s18 = scalar_lea.vmem %s1181_s0, %s823_s15  ;;  %v802_v34 = vld [vmem:[%s1182_s1 + $0x2] sm:$0x3]  ;;  %v319_v37 = vld [vmem:[%s1182_s1] sm:$0x3]  ;;  %v806_v40 = vld [vmem:[%s1182_s1 + $0x6] sm:$0x3]  ;;  %v390_v57 = vrot.slane %v386_v49, %v966_v10  ;;  %v394_v58 = vrot.slane %v386_v49, %v969_v11 }
  0x10   : > { %v951_v6 = vld [vmem:[%s300_s18] sm:$0xff]  ;;  %vm351_vm3 = vcmp.ne.f32.partialorder %v802_v34, 0.0  ;;  %vm320_vm4 = vcmp.ne.f32.partialorder %v319_v37, 0.0  ;;  %vm419_vm6 = vcmp.ne.f32.partialorder %v806_v40, 0.0  ;;  %vm380_vm13 = vcmp.lt.s32.totalorder %v1059_v43, 15  ;;  %s824_s11 = sshll.u32 %s1211_s28, 4 }
  0x11   : > { %v955_v7 = vcombine.high %v951_v6, %v951_v6  ;;  %310 = vrot.lane.b32.xlu0 %v951_v6, %s870_s19  ;;  %v458_v18 = vsel %vm979_vm1, %v951_v6, 0.0  ;;  %v352_v39 = vsel %vm351_vm3, 1, %v869_v2  ;;  %v321_v44 = vsel %vm320_vm4, 1, %v869_v2  ;;  %s305_s14 = scalar_lea.vmem %s1189_s8, %s824_s11 }
  0x12   : > { %v356_v45 = vrot.slane %v352_v39, %v966_v10  ;;  %v360_v46 = vrot.slane %v352_v39, %v969_v11  ;;  %v325_v50 = vrot.slane %v321_v44, %v966_v10  ;;  %v329_v51 = vrot.slane %v321_v44, %v969_v11 }
  0x13   : > { %312 = vrot.lane.b32.xlu1 %v955_v7, %s870_s19  ;;  %v459_v19 = vsel %vm983_vm2, %v955_v7, 0.0  ;;  %v420_v52 = vsel %vm419_vm6, 1, %v869_v2  ;;  %vm1098_vm14 = vcmp.eq.s32.totalorder %v390_v57, 1  ;;  %vm1102_vm15 = vcmp.eq.s32.totalorder %v394_v58, 1  ;;  %v814_v58 = vld [vmem:[%s1182_s1 + $0xe] sm:$0x3] }
  0x14   : > { %vm1070_vm9 = vcmp.eq.s32.totalorder %v356_v45, 1  ;;  %vm1074_vm10 = vcmp.eq.s32.totalorder %v360_v46, 1  ;;  %v424_v61 = vrot.slane %v420_v52, %v966_v10  ;;  %vm1084_vm11 = vcmp.eq.s32.totalorder %v325_v50, 1  ;;  %v812_v45 = vld [vmem:[%s1182_s1 + $0xc] sm:$0x3] }
  0x15   : > { %342 = vrot.lane.b32.xlu0 %v951_v6, %s871_s22  ;;  %vm1088_vm12 = vcmp.eq.s32.totalorder %v329_v51, 1  ;;  %v428_v9 = vrot.slane %v420_v52, %v969_v11  ;;  %vm480_vm0 = vcmp.ne.f32.partialorder %v810_v62, 0.0  ;;  %vm414_vm3 = vcmp.lt.s32.totalorder %v1059_v43, 1  ;;  %v816_v62 = vld [vmem:[%s1182_s1 + $0x10] sm:$0x3] }
  0x16   : > { %vm1111_vm4 = vcmp.eq.s32.totalorder %v424_v61, 1  ;;  %vm514_vm6 = vcmp.ne.f32.partialorder %v812_v45, 0.0  ;;  %vm548_vm1 = vcmp.ne.f32.partialorder %v814_v58, 0.0  ;;  %vm582_vm2 = vcmp.ne.f32.partialorder %v816_v62, 0.0 }
  0x17   : > { %344 = vrot.lane.b32.xlu1 %v955_v7, %s871_s22  ;;  %vm1119_vm5 = vcmp.eq.s32.totalorder %v428_v9, 1 }
  0x19   : > { %464 = vperm.xlu0 %842, %v809_v13  }
  0x1b   : > { %376 = vrot.lane.b32.xlu1 %v951_v6, %s872_s25 }
  0x1d   : > { %378 = vrot.lane.b32.xlu0 %v955_v7, %s872_s25 }
  0x1f   : > { %498 = vperm.xlu1 %843, %v811_v20  }
  0x21   : > { %410 = vrot.lane.b32.xlu0 %v951_v6, %s873_s30 }
  0x23   : > { %412 = vrot.lane.b32.xlu1 %v955_v7, %s873_s30 }
  0x25   : > { %532 = vperm.xlu0 %842, %v813_v21  }
  0x27   : > { %566 = vperm.xlu1 %843, %v815_v22  }
  0x29   : > { %471 = vrot.lane.b32.xlu0 %v951_v6, %s874_s13 }
  0x2b   : > { %473 = vrot.lane.b32.xlu1 %v955_v7, %s874_s13 }
  0x2d   : > { %600 = vperm.xlu0 %842, %v817_v23  }
  0x2f   : > { %505 = vrot.lane.b32.xlu1 %v951_v6, %s875_s16 }
  0x31   : > { %507 = vrot.lane.b32.xlu0 %v955_v7, %s875_s16 }
  0x33   : > { %539 = vrot.lane.b32.xlu1 %v951_v6, %s876_s17 }
  0x35   : > { %541 = vrot.lane.b32.xlu0 %v955_v7, %s876_s17 }
  0x37   : > { %610 = vperm.xlu1 %843, %v607_v24  }
  0x39   : > { %573 = vrot.lane.b32.xlu0 %v951_v6, %s877_s20  ;;  %v515_v6 = vsel %vm514_vm6, 1, %v869_v2 }
  0x3a   : > { %v519_v61 = vrot.slane %v515_v6, %v966_v10 }
  0x3b   : > { %575 = vrot.lane.b32.xlu1 %v955_v7, %s877_s20 }
  0x3d   : > { %618 = vperm.xlu0 %842, %v615_v25  }
  0x3f   : > { %646 = vperm.xlu1 %843, %v635_v26  }
  0x41   : > { %663 = vperm.xlu0 %842, %v818_v27  }
  0x43   : > { %682 = vperm.xlu1 %843, %v819_v28  }
  0x45   : > { %701 = vperm.xlu0 %842, %v820_v29  }
  0x47   : > { %711 = vperm.xlu1 %843, %v708_v30   ;;  %v481_v30 = vsel %vm480_vm0, 1, %v869_v2  ;;  %vm577_vm0 = vcmp.lt.s32.totalorder %v1059_v43, 111 }
  0x48   : > { %v485_v46 = vrot.slane %v481_v30, %v966_v10 }
  0x49   : > { %719 = vperm.xlu0 %842, %v716_v31  }
  0x86   : > { %v1041_v32 = vpop.permute.xlu1 %403  ;;  %v338_v33 = vpop.permute.xlu0 %337 }
  0x8a   : > { %v1046_v35 = vpop.permute.xlu1 %437  ;;  %v370_v36 = vpop.permute.xlu0 %369 }
  0x8e   : > { %v311_v41 = vpop.permute.xlu0 %310  ;;  %v313_v42 = vpop.permute.xlu1 %312 }
  0x8f   : > { %v317_v1 = vsel %vm316_vm8, %v311_v41, %v313_v42  ;;  %v318_v3 = vsel %vm316_vm8, %v313_v42, %v311_v41  ;;  %vm490_vm8 = vcmp.eq.s32.totalorder %v485_v46, 1 }
  0x90   : > { %v332_v14 = vsel %vm1084_vm11, %v318_v3, 0.0  ;;  %v333_v15 = vsel %vm1088_vm12, %v317_v1, 0.0  ;;  %v523_v1 = vrot.slane %v515_v6, %v969_v11  ;;  %v549_v3 = vsel %vm548_vm1, 1, %v869_v2 }
  0x91   : > { %v340_v31 = vmul.f32 %v338_v33, %v332_v14  ;;  %v341_v34 = vmul.f32 %v338_v33, %v333_v15  ;;  %v553_v13 = vrot.slane %v549_v3, %v966_v10  ;;  %v557_v14 = vrot.slane %v549_v3, %v969_v11 }
  0x92   : > { %v343_v47 = vpop.permute.xlu0 %342  ;;  %v345_v48 = vpop.permute.xlu1 %344  ;;  %vm524_vm11 = vcmp.eq.s32.totalorder %v519_v61, 1  ;;  %vm525_vm12 = vcmp.eq.s32.totalorder %v523_v1, 1 }
  0x93   : > { %v347_v55 = vsel %vm346_vm7, %v343_v47, %v345_v48  ;;  %v348_v56 = vsel %vm346_vm7, %v345_v48, %v343_v47  ;;  %v489_v47 = vrot.slane %v481_v30, %v969_v11  ;;  %vm475_vm7 = vcmp.lt.s32.totalorder %v1059_v43, 127 }
  0x94   : > { %v363_v4 = vsel %vm1070_vm9, %v348_v56, 0.0  ;;  %v364_v5 = vsel %vm1074_vm10, %v347_v55, 0.0  ;;  %vm509_vm10 = vcmp.lt.s32.totalorder %v1059_v43, 113 }
  0x95   : > { %v372_v23 = vmul.f32 %v370_v36, %v363_v4  ;;  %v373_v24 = vmul.f32 %v370_v36, %v364_v5  ;;  %vm491_vm9 = vcmp.eq.s32.totalorder %v489_v47, 1 }
  0x96   : > { %v377_v60 = vpop.permute.xlu1 %376 }
  0x97   : > { %v374_v40 = vadd.f32 %v372_v23, %v340_v31  ;;  %v375_v41 = vadd.f32 %v373_v24, %v341_v34 }
  0x98   : > { %v465_v59 = vpop.permute.xlu0 %464 }
  0x99   : > { %v467_v54 = vmul.f32 %v465_v59, %v458_v18  ;;  %v468_v55 = vmul.f32 %v465_v59, %v459_v19 }
  0x9c   : > { %v379_v20 = vpop.permute.xlu0 %378 }
  0x9d   : > { %v381_v25 = vsel %vm380_vm13, %v377_v60, %v379_v20  ;;  %v382_v26 = vsel %vm380_vm13, %v379_v20, %v377_v60  ;;  %vm543_vm13 = vcmp.lt.s32.totalorder %v1059_v43, 112 }
  0x9e   : > { %v499_v21 = vpop.permute.xlu1 %498  ;;  %v397_v27 = vsel %vm1098_vm14, %v382_v26, 0.0  ;;  %v398_v28 = vsel %vm1102_vm15, %v381_v25, 0.0  ;;  %vm558_vm14 = vcmp.eq.s32.totalorder %v553_v13, 1  ;;  %vm559_vm15 = vcmp.eq.s32.totalorder %v557_v14, 1 }
  0x9f   : > { %v406_v37 = vmul.f32 %v1041_v32, %v397_v27  ;;  %v407_v36 = vmul.f32 %v1041_v32, %v398_v28 }
  0xa0   : > { %v411_v38 = vpop.permute.xlu0 %410 }
  0xa1   : > { %v408_v48 = vadd.f32 %v406_v37, %v374_v40  ;;  %v409_v49 = vadd.f32 %v407_v36, %v375_v41 }
  0xa2   : > { %v413_v39 = vpop.permute.xlu1 %412 }
  0xa3   : > { %v415_v42 = vsel %vm414_vm3, %v411_v38, %v413_v39  ;;  %v416_v44 = vsel %vm414_vm3, %v413_v39, %v411_v38 }
  0xa4   : > { %v431_v33 = vsel %vm1111_vm4, %v416_v44, 0.0  ;;  %v432_v32 = vsel %vm1119_vm5, %v415_v42, 0.0  ;;  %v533_v52 = vpop.permute.xlu0 %532 }
  0xa5   : > { %v440_v50 = vmul.f32 %v1046_v35, %v431_v33  ;;  %v441_v51 = vmul.f32 %v1046_v35, %v432_v32 }
  0xa6   : > { %v567_v53 = vpop.permute.xlu1 %566 }
  0xa7   : > { %v442_v56 = vadd.f32 %v440_v50, %v408_v48  ;;  %v443_v57 = vadd.f32 %v441_v51, %v409_v49 }
  0xa8   : > { %v472_v18 = vpop.permute.xlu0 %471 }
  0xa9   : > { %v469_v35 = vadd.f32 %v467_v54, %v442_v56  ;;  %v470_v16 = vadd.f32 %v468_v55, %v443_v57 }
  0xaa   : > { %v474_v60 = vpop.permute.xlu1 %473 }
  0xab   : > { %v476_v17 = vsel %vm475_vm7, %v472_v18, %v474_v60  ;;  %v477_v7 = vsel %vm475_vm7, %v474_v60, %v472_v18 }
  0xac   : > { %v492_v19 = vsel %vm490_vm8, %v476_v17, 0.0  ;;  %v493_v59 = vsel %vm491_vm9, %v477_v7, 0.0  ;;  %v601_v4 = vpop.permute.xlu0 %600  ;;  %v674_v7 = vsub.s32 2, %v958_v8 }
  0xad   : > { %v501_v63 = vmul.f32 %v499_v21, %v492_v19  ;;  %v502_v0 = vmul.f32 %v499_v21, %v493_v59  ;;  %v583_v21 = vsel %vm582_vm2, 1, %v869_v2 }
  0xae   : > { %v506_v5 = vpop.permute.xlu1 %505  ;;  %v587_v28 = vrot.slane %v583_v21, %v966_v10  ;;  %v591_v29 = vrot.slane %v583_v21, %v969_v11 }
  0xaf   : > { %v503_v9 = vadd.f32 %v501_v63, %v469_v35  ;;  %v504_v12 = vadd.f32 %v502_v0, %v470_v16  ;;  %v693_v63 = vsub.s32 3, %v958_v8 }
  0xb0   : > { %v508_v15 = vpop.permute.xlu0 %507  ;;  %vm592_vm3 = vcmp.eq.s32.totalorder %v587_v28, 1  ;;  %vm593_vm4 = vcmp.eq.s32.totalorder %v591_v29, 1 }
  0xb1   : > { %v510_v22 = vsel %vm509_vm10, %v506_v5, %v508_v15  ;;  %v511_v23 = vsel %vm509_vm10, %v508_v15, %v506_v5 }
  0xb2   : > { %v540_v20 = vpop.permute.xlu1 %539  ;;  %v526_v24 = vsel %vm524_vm11, %v510_v22, 0.0  ;;  %v527_v25 = vsel %vm525_vm12, %v511_v23, 0.0 }
  0xb3   : > { %v535_v26 = vmul.f32 %v533_v52, %v526_v24  ;;  %v536_v27 = vmul.f32 %v533_v52, %v527_v25 }
  0xb4   : > { %v542_v30 = vpop.permute.xlu0 %541 }
  0xb5   : > { %v537_v34 = vadd.f32 %v535_v26, %v503_v9  ;;  %v538_v37 = vadd.f32 %v536_v27, %v504_v12  ;;  %v544_v36 = vsel %vm543_vm13, %v540_v20, %v542_v30  ;;  %v545_v2 = vsel %vm543_vm13, %v542_v30, %v540_v20 }
  0xb6   : > { %v611_v31 = vpop.permute.xlu1 %610  ;;  %v560_v38 = vsel %vm558_vm14, %v544_v36, 0.0  ;;  %v561_v39 = vsel %vm559_vm15, %v545_v2, 0.0 }
  0xb7   : > { %v569_v40 = vmul.f32 %v567_v53, %v560_v38  ;;  %v570_v41 = vmul.f32 %v567_v53, %v561_v39 }
  0xb8   : > { %v574_v42 = vpop.permute.xlu0 %573 }
  0xb9   : > { %v571_v45 = vadd.f32 %v569_v40, %v537_v34  ;;  %v572_v33 = vadd.f32 %v570_v41, %v538_v37 }
  0xba   : > { %v576_v44 = vpop.permute.xlu1 %575 }
  0xbb   : > { %v578_v32 = vsel %vm577_vm0, %v574_v42, %v576_v44  ;;  %v579_v46 = vsel %vm577_vm0, %v576_v44, %v574_v42 }
  0xbc   : > { %v594_v47 = vsel %vm592_vm3, %v578_v32, 0.0  ;;  %v595_v48 = vsel %vm593_vm4, %v579_v46, 0.0  ;;  %v619_v56 = vpop.permute.xlu0 %618 }
  0xbd   : > { %v603_v49 = vmul.f32 %v601_v4, %v594_v47  ;;  %v604_v50 = vmul.f32 %v601_v4, %v595_v48 }
  0xbe   : > { %v647_v59 = vpop.permute.xlu1 %646 }
  0xbf   : > { %v605_v51 = vadd.f32 %v603_v49, %v571_v45  ;;  %v606_v52 = vadd.f32 %v604_v50, %v572_v33 }
  0xc0   : > { %v664_v1 = vpop.permute.xlu0 %663 }
  0xc1   : > { %v613_v54 = vmul.f32 %v611_v31, %v605_v51  ;;  %v614_v55 = vmul.f32 %v611_v31, %v606_v52 }
  0xc2   : > { %v683_v23 = vpop.permute.xlu1 %682 }
  0xc3   : > { %v621_v43 = vadd.f32 %v619_v56, %v613_v54  ;;  %v622_v57 = vadd.f32 %v619_v56, %v614_v55 }
  0xc4   : > { %v702_v28 = vpop.permute.xlu0 %701 }
  0xc5   : > { %v623_v53 = vsub.f32 0.0, %v621_v43  ;;  %v624_v58 = vsub.f32 0.0, %v622_v57 }
  0xc6   : > { %v712_v37 = vpop.permute.xlu1 %711 }
  0xc7   : > { %v625_v35 = vmul.f32 1.442695, %v623_v53  ;;  %v627_v16 = vmul.f32 1.442695, %v624_v58 }
  0xc8   : > { %v720_v38 = vpop.permute.xlu0 %719 }
  0xc9   : > { %845 = vpow2.f32 %v625_v35 }
  0xca   : > { %847 = vpow2.f32 %v627_v16 }
  0xd3   : > { %v846_v6 = vpop.eup %845 }
  0xd4   : > { %v848_v18 = vpop.eup %847  ;;  %v629_v60 = vadd.f32 1.0, %v846_v6 }
  0xd5   : > { %v630_v17 = vadd.f32 1.0, %v848_v18 }
  0xd6   : > { %849 = vrcp.f32 %v629_v60 }
  0xd7   : > { %851 = vrcp.f32 %v630_v17 }
  0xe0   : > { %v850_v19 = vpop.eup %849 }
  0xe1   : > { %v852_v61 = vpop.eup %851  ;;  %v633_v62 = vmul.f32 %v850_v19, %v621_v43 }
  0xe2   : > { %v634_v0 = vmul.f32 %v852_v61, %v622_v57 }
  0xe3   : > { %v639_v3 = vrot.slane %v633_v62, %v966_v10  ;;  %v656_v4 = vrot.slane %v633_v62, %v969_v11  ;;  %v675_v5 = vrot.slane %v633_v62, %v674_v7  ;;  %v694_v20 = vrot.slane %v633_v62, %v693_v63 }
  0xe4   : > { %v643_v9 = vrot.slane %v634_v0, %v966_v10  ;;  %v660_v12 = vrot.slane %v634_v0, %v969_v11  ;;  %v679_v13 = vrot.slane %v634_v0, %v674_v7  ;;  %v698_v24 = vrot.slane %v634_v0, %v693_v63 }
  0xe5   : > { %v649_v14 = vmul.f32 %v647_v59, %v639_v3  ;;  %v666_v15 = vmul.f32 %v664_v1, %v656_v4  ;;  %v685_v25 = vmul.f32 %v683_v23, %v675_v5  ;;  %v704_v30 = vmul.f32 %v702_v28, %v694_v20 }
  0xe6   : > { %v650_v21 = vmul.f32 %v647_v59, %v643_v9  ;;  %v667_v22 = vmul.f32 %v664_v1, %v660_v12  ;;  %v686_v27 = vmul.f32 %v683_v23, %v679_v13  ;;  %v705_v34 = vmul.f32 %v702_v28, %v698_v24 }
  0xe7   : > { %v668_v8 = vadd.f32 %v666_v15, %v649_v14 }
  0xe8   : > { %v669_v26 = vadd.f32 %v667_v22, %v650_v21 }
  0xe9   : > { %v687_v29 = vadd.f32 %v685_v25, %v668_v8 }
  0xea   : > { %v688_v31 = vadd.f32 %v686_v27, %v669_v26 }
  0xeb   : > { %v706_v10 = vadd.f32 %v704_v30, %v687_v29 }
  0xec   : > { %v707_v11 = vadd.f32 %v705_v34, %v688_v31 }
  0xed   : > { %v714_v36 = vmul.f32 %v712_v37, %v706_v10 }
  0xee   : > { %v715_v2 = vmul.f32 %v712_v37, %v707_v11 }
  0xef   : > { %v722_v39 = vadd.f32 %v720_v38, %v714_v36 }
  0xf0   : > { %v723_v40 = vadd.f32 %v720_v38, %v715_v2 }
  0xf1   : > { %v724_v41 = vsub.f32 0.0, %v722_v39 }
  0xf2   : > { %v725_v42 = vsub.f32 0.0, %v723_v40 }
  0xf3   : > { %v726_v44 = vmul.f32 1.442695, %v724_v41 }
  0xf4   : > { %v728_v45 = vmul.f32 1.442695, %v725_v42 }
  0xf5   : > { %853 = vpow2.f32 %v726_v44 }
  0xf6   : > { %855 = vpow2.f32 %v728_v45 }
  0xff   : > { %v854_v33 = vpop.eup %853 }
 0x100   : > { %v856_v32 = vpop.eup %855  ;;  %v730_v46 = vadd.f32 1.0, %v854_v33 }
 0x101   : > { %v731_v47 = vadd.f32 1.0, %v856_v32 }
 0x102   : > { %857 = vrcp.f32 %v730_v46 }
 0x103   : > { %859 = vrcp.f32 %v731_v47 }
 0x10c   : > { %v858_v48 = vpop.eup %857 }
 0x10d   : > { %v860_v49 = vpop.eup %859  ;;  %v734_v50 = vmul.f32 %v858_v48, %v722_v39 }
 0x10e   : > { %v735_v51 = vmul.f32 %v860_v49, %v723_v40 }
 0x10f   : > { %736 = vst [vmem:[%s305_s14] sm:$0xff] %v734_v50 }
 0x110   : > { %737 = vst [vmem:[%s305_s14 + $0x8] sm:$0xff] %v735_v51 }
 0x111 PF: > { %s18_s27 = sadd.s32 1, %s867_s27  }
 0x112   : > { %p15_p4 = scmp.ge.s32.totalorder %s18_s27, 4  }
 0x114   :  { %17 = sbr.rel (!%p15_p4) target bundleno = 1 (0x1), region = 101 }

</bundles_post_ra>
